<compile_context>
chip_gen: v7x
topology: tpu7x:2x2x1
jax: 0.10.0
libtpu: 0.0.40
codegen_flags: <defaults>
</compile_context>

<pallas_src>
import jax
import jax.numpy as jnp
from jax.experimental import pallas as pl
from jax.experimental.pallas import tpu as pltpu


def _copy_kernel(x_ref, o_ref):
    # Straight lane-dense tile copy: (tile_r, tile_l) block in -> same block out.
    o_ref[...] = x_ref[...]


def _chip_config():
    """(target_block_bytes, vmem_limit_bytes_or_None, num_tensorcores)."""
    kind = ""
    try:
        kind = jax.devices()[0].device_kind.lower()
    except Exception:
        pass
    if "v7" in kind:
        # 2 x (in + out) x 6 MiB = 24 MiB resident; bump scoped VMEM (64 MiB phys).
        return 6 << 20, 48 << 20, 2
    if "v6" in kind:
        # 16 MiB resident, inside the 32 MiB scoped-VMEM default.
        return 4 << 20, None, 1
    # v5e / unknown: 8 MiB resident, inside the 16 MiB scoped-VMEM default.
    return 2 << 20, None, 1


def _round_down(v, m):
    return (v // m) * m


def _launch_copy(x2, tile_r, tile_l, vmem_limit, bytes_accessed):
    rows, lane = x2.shape
    grid = (pl.cdiv(rows, tile_r), pl.cdiv(lane, tile_l))
    cp_kwargs = dict(dimension_semantics=("parallel", "parallel"))
    if vmem_limit is not None:
        cp_kwargs["vmem_limit_bytes"] = vmem_limit
    return pl.pallas_call(
        _copy_kernel,
        out_shape=jax.ShapeDtypeStruct((rows, lane), x2.dtype),
        grid_spec=pltpu.PrefetchScalarGridSpec(
            num_scalar_prefetch=0,
            grid=grid,
            in_specs=[pl.BlockSpec((tile_r, tile_l), lambda i, j: (i, j))],
            out_specs=pl.BlockSpec((tile_r, tile_l), lambda i, j: (i, j)),
        ),
        # Same shape/dtype in and out -> alias so no second HBM buffer is
        # allocated for the materialized copy.
        input_output_aliases={0: 0},
        compiler_params=pltpu.CompilerParams(**cp_kwargs),
        cost_estimate=pl.CostEstimate(
            flops=0, transcendentals=0, bytes_accessed=bytes_accessed),
    )(x2)


def flatten(x, *, copy=True):
    """Equivalent of torch Flatten().forward(x): returns x reshaped to (N, -1)."""
    n = x.shape[0]
    d = 1
    for s in x.shape[1:]:
        d *= s

    if not copy:
        # Row-major flatten is a pure metadata reshape: 0 bytes of HBM traffic.
        return jnp.reshape(x, (n, d))

    total = n * d
    itemsize = jnp.dtype(x.dtype).itemsize
    sub = max(8, 32 // itemsize)              # sublane multiple: 8/16/32 by dtype
    block_bytes, vmem_limit, num_cores = _chip_config()
    bytes_accessed = 2 * total * itemsize

    # ---- fast path: lane-dense repack of the flat buffer -------------------
    # Any (rows, lane) factorization of the row-major flat buffer is
    # bit-identical to (n, d) after a final metadata reshape; pick lane as a
    # multiple of 128 so vregs are fully lane-packed even when n < 8.
    lane = next((c for c in (1024, 512, 256, 128) if total % c == 0), None)
    if lane is not None:
        rows = total // lane
        x2 = jnp.reshape(x, (rows, lane))

        tile_r = max(sub, _round_down(block_bytes // (lane * itemsize), sub))
        if tile_r >= rows:
            tile_r = rows                     # full extent: always a legal block dim
        tile_l = lane                         # keep each block's DMA contiguous

        # Megacore (2-TC) chips only: if the grid collapsed to a single step,
        # split ROWS (not lanes) so both TensorCores get work.
        if num_cores > 1 and tile_r >= rows and rows >= 2 * sub:
            half = -(-rows // 2)
            cand = -(-half // sub) * sub
            if cand < rows:
                tile_r = cand

        out2 = _launch_copy(x2, tile_r, tile_l, vmem_limit, bytes_accessed)
        return jnp.reshape(out2, (n, d))

    # ---- fallback: total not a multiple of 128 ------------------------------
    # Tile the logical (n, d) view with (sub, 128)-aligned blocks and ragged
    # (masked) edge blocks; VMEM use stays bounded regardless of d.
    x2 = jnp.reshape(x, (n, d))
    if d >= 128:
        tile_l = min(_round_down(d, 128),
                     max(128, _round_down(block_bytes // (sub * itemsize), 128)))
    else:
        tile_l = d                            # < 128 lanes: full extent (masked stores)
    tile_r = max(sub, _round_down(block_bytes // (tile_l * itemsize), sub))
    if tile_r >= n:
        tile_r = n
    return _launch_copy(x2, tile_r, tile_l, vmem_limit, bytes_accessed)


if __name__ == "__main__":
    key = jax.random.PRNGKey(0)

    # Small NCHW input consistent with a GAN conv feature map:
    # (batch=2, C=4, H=16, W=16)
    x = jax.random.normal(key, (2, 4, 16, 16), dtype=jnp.float32)
    y = flatten(x)
    jax.block_until_ready(y)

    assert y.shape == (2, 4 * 16 * 16), y.shape
    assert y.dtype == x.dtype
    # Bitwise match against the reference row-major flatten (== torch .view).
    assert bool(jnp.array_equal(y, jnp.reshape(x, (2, -1))))

    # Odd, non-128-divisible shape exercises the bounded ragged-block fallback.
    x_odd = jax.random.normal(jax.random.PRNGKey(1), (2, 3, 5, 7),
                              dtype=jnp.float32)
    y_odd = flatten(x_odd)
    jax.block_until_ready(y_odd)
    assert y_odd.shape == (2, 3 * 5 * 7), y_odd.shape
    assert bool(jnp.array_equal(y_odd, jnp.reshape(x_odd, (2, -1))))

    # Zero-copy (metadata reshape) path.
    y_view = flatten(x, copy=False)
    jax.block_until_ready(y_view)
    assert bool(jnp.array_equal(y_view, y))

    print("KERNEL_OK")
</pallas_src>

<mosaic_0001>
module attributes {stable_mosaic.version = 11 : i64} {
  func.func @_copy_kernel(%arg0: i32, %arg1: i32, %arg2: memref<2x1024xf32, #tpu.memory_space<vmem>>, %arg3: memref<2x1024xf32, #tpu.memory_space<vmem>>) attributes {dimension_semantics = [#tpu.dimension_semantics<parallel>, #tpu.dimension_semantics<parallel>], iteration_bounds = array<i64: 1, 1>, scalar_prefetch = 0 : i64, scratch_operands = 0 : i64, tpu.core_type = #tpu.core_type<tc>, window_params = [{transform_indices = @transform_0, window_bounds = array<i64: 2, 1024>}, {transform_indices = @transform_1, window_bounds = array<i64: 2, 1024>}]} {
    %c0 = arith.constant 0 : index
    %c0_0 = arith.constant 0 : index
    %0 = vector.load %arg2[%c0, %c0_0] : memref<2x1024xf32, #tpu.memory_space<vmem>>, vector<2x1024xf32>
    %c0_1 = arith.constant 0 : index
    %c0_2 = arith.constant 0 : index
    %1 = vector.load %arg3[%c0_1, %c0_2] : memref<2x1024xf32, #tpu.memory_space<vmem>>, vector<2x1024xf32>
    tpu.vector_store %arg3[%c0_1, %c0_2], %0 {strides = array<i32>} : memref<2x1024xf32, #tpu.memory_space<vmem>>, vector<2x1024xf32>,
    return
  }
  func.func @transform_0(%arg0: i32, %arg1: i32) -> (i32, i32) {
    %c0_i32 = arith.constant 0 : i32
    return %arg0, %arg1 : i32, i32
  }
  func.func @transform_1(%arg0: i32, %arg1: i32) -> (i32, i32) {
    %c0_i32 = arith.constant 0 : i32
    return %arg0, %arg1 : i32, i32
  }
}

</mosaic_0001>

<bundles_post_ra>
// kernel: tpu_custom_call.1
= control target key start
LH: loop header
LB: loop body
LE: loop exit
PB: predicated region body
PF: predicated region fallthrough
CT: control target
= control target key end

     0   :  { %6 = vsyncpa [#allocation3], 0  ;;  %s126_s0 = inlined_call_operand.hbm [shape: f32[2,1024], index: 0, kind: input, shape index: {}, may-alias: {0,1}]   ;;  %s127_s1 = inlined_call_operand.hbm [shape: f32[2,1024], index: 1, kind: output, shape index: {}, may-alias: {0,1}]  }
   0x1   :  { %7 = vsyncpa [#allocation4], 0  ;;  %s90_s6 = smov [#allocation2]   ;;  %s42_s10 = scalar_lea.hbm %s126_s0, 256 }
   0x2   :  { %s14_s7 = sshll.u32 %s90_s6, 4  ;;  %p43_p0 = scmp.ne.s32.totalorder %s126_s0, %s42_s10  ;;  %s15_s7 = int_to_ptr.vmem [resolvable:$true] %s14_s7 }
   0x3   :  { %p46_p1 = scmp.lt.u32.totalorder %s42_s10, %s126_s0 }
   0x5   :  { %p48_p2 = pnand %p46_p1, %p43_p0 }
   0x7   :  { %51 = shalt.err (!%p48_p2)
}
   0x8   :  { %s52_s15 = scalar_lea.vmem %s15_s7, 256  ;;  %p57_p4 = scmp.lt.s32.totalorder %s15_s7, %s15_s7 }
   0x9   :  { %p53_p3 = scmp.ne.s32.totalorder %s15_s7, %s52_s15  ;;  %p58_p5 = scmp.lt.s32.totalorder %s52_s15, %s52_s15 }
   0xb   :  { %p59_p6 = por %p58_p5, %p57_p4 }
   0xd   :  { %p60_p7 = pnand %p59_p6, %p53_p3 }
   0xf   :  { %63 = shalt.err (!%p60_p7)
}
  0x10   :  { %17 = dma.hbm_to_vmem [thread:$0]  %s126_s0, 256, %s15_s7, [#allocation3]  }
  0x11   :  { %86 = dma.done.wait [#allocation3], 256  }
  0x12   :  { %87 = vsyncadd [#allocation3], 4294967040  ;;  %s91_s18 = smov [#allocation5]   ;;  %v21_v0 = vld [vmem:[#allocation2] sm:$0xff]  ;;  %v22_v1 = vld [vmem:[#allocation2 + $0x8] sm:$0xff] }
  0x13   :  { %s31_s19 = sshll.u32 %s91_s18, 4  ;;  %23 = vst [vmem:[#allocation5] sm:$0xff] %v21_v0  ;;  %24 = vst [vmem:[#allocation5 + $0x8] sm:$0xff] %v22_v1  ;;  %s32_s19 = int_to_ptr.vmem [resolvable:$true] %s31_s19 }
  0x14   :  { %s64_s20 = scalar_lea.vmem %s32_s19, 256  ;;  %p69_p9 = scmp.lt.s32.totalorder %s32_s19, %s32_s19 }
  0x15   :  { %p65_p8 = scmp.ne.s32.totalorder %s32_s19, %s64_s20  ;;  %p70_p10 = scmp.lt.s32.totalorder %s64_s20, %s64_s20 }
  0x17   :  { %p71_p11 = por %p70_p10, %p69_p9 }
  0x19   :  { %p72_p12 = pnand %p71_p11, %p65_p8 }
  0x1b   :  { %75 = shalt.err (!%p72_p12)
}
  0x1c   :  { %s76_s0 = scalar_lea.hbm %s127_s1, 256 }
  0x1d   :  { %p77_p13 = scmp.ne.s32.totalorder %s127_s1, %s76_s0  ;;  %p80_p0 = scmp.lt.u32.totalorder %s76_s0, %s127_s1 }
  0x1f   :  { %p82_p1 = pnand %p80_p0, %p77_p13 }
  0x21   :  { %85 = shalt.err (!%p82_p1)
}
  0x22   :  { %34 = dma.vmem_to_hbm [thread:$0]  %s32_s19, 256, %s127_s1, [#allocation4]  }
  0x23   :  { %88 = dma.done.wait [#allocation4], 256  }
  0x24   :  { %89 = vsyncadd [#allocation4], 4294967040 }
  0x25   :  { %38 = vsyncpa [#allocation3], 1 }
  0x26   :  { %39 = vsyncpa [#allocation4], 1 }

</bundles_post_ra>
